<compile_context>
chip_gen: v6e
topology: v6e:2x2x1
jax: 0.10.0
libtpu: 0.0.40
codegen_flags: <defaults>
</compile_context>

<pallas_src>
import functools

import jax
import jax.numpy as jnp
from jax import lax
from jax.experimental import pallas as pl
from jax.experimental.pallas import tpu as pltpu


def _bnorm(v, gamma, beta):
    """Training-mode batch norm over the lane axis (per channel), single pass."""
    l = v.shape[1]
    inv_l = 1.0 / float(l)
    mean = jnp.sum(v, axis=1, keepdims=True) * inv_l         # (c, 1)
    ex2 = jnp.sum(v * v, axis=1, keepdims=True) * inv_l      # (c, 1)
    var = ex2 - mean * mean
    return (v - mean) * lax.rsqrt(var + 1e-5) * gamma + beta


def _skip_kernel(apply_bn, h, w,
                 p1_ref, xs_ref, yc_ref, xc_ref,
                 w1_ref, b1_ref, w2_ref, b2_ref,
                 g1_ref, bt1_ref, g2_ref, bt2_ref,
                 o_ref):
    """One grid step (one batch image, or the whole batch when apply_bn).

    p1_ref : (9c, L) im2col patches of the input (built in the wrapper).
    xs_ref : (c, L)  skip-connection input.
    yc/xc  : (1, L)  int32 per-lane y/x pixel coordinates (boundary masks).
    w*_ref : (c, 9c) conv weights.  b*/g*/bt*_ref: (c, 1).
    o_ref  : (c, L)  lane-dense output block.
    """
    L = o_ref.shape[-1]

    # ---- conv1: single im2col matmul (K = 9c) + lane-broadcast bias ----
    a = jnp.dot(w1_ref[...], p1_ref[...], preferred_element_type=jnp.float32)
    a = a + b1_ref[...]
    if apply_bn:
        a = _bnorm(a, g1_ref[...], bt1_ref[...])
    a = jnp.maximum(a, 0.0)                                   # (c, L)

    # ---- conv2: build (9c, L) patch slab from `a` via lane rolls + masks ----
    y = yc_ref[...]                                           # (1, L) int32
    x = xc_ref[...]
    tap_vals = []
    for ky in range(3):
        for kx in range(3):
            dy, dx = ky - 1, kx - 1
            s = dy * w + dx                                   # lane offset
            shifted = a if s == 0 else pltpu.roll(a, (-s) % L, axis=1)
            valid = ((y + dy >= 0) & (y + dy < h) &
                     (x + dx >= 0) & (x + dx < w))            # (1, L)
            tap_vals.append(jnp.where(valid, shifted, 0.0))
    p2 = jnp.concatenate(tap_vals, axis=0)                    # (9c, L)

    out = jnp.dot(w2_ref[...], p2, preferred_element_type=jnp.float32)
    out = out + b2_ref[...]
    if apply_bn:
        out = _bnorm(out, g2_ref[...], bt2_ref[...])

    # ---- skip connection + final relu, lane-dense store ----
    o_ref[...] = jnp.maximum(out + xs_ref[...], 0.0)


def simple_skip_layer(x_nchw, params, apply_batch_norm=False):
    """Forward pass of SimpleSkipLayer.  x_nchw: (N, C, H, W) -> (N, C, H, W)."""
    x = x_nchw.astype(jnp.float32)
    n, c, h, w = x.shape
    hw = h * w

    # im2col patches of the spatially padded input: (n, 9c, h*w),
    # K-index = tap*c + ci with tap = ky*3 + kx (matches the weight reshape).
    xpad = jnp.pad(x, ((0, 0), (0, 0), (1, 1), (1, 1)))
    tap_slices = [xpad[:, :, ky:ky + h, kx:kx + w]            # (n, c, h, w)
                  for ky in range(3) for kx in range(3)]
    p1 = jnp.stack(tap_slices, axis=1).reshape(n, 9 * c, hw)  # (n, 9c, hw)
    xs = x.reshape(n, c, hw)                                  # skip, (c on sublanes)

    # Per-lane pixel coordinates for conv2 boundary masks (no in-kernel idiv).
    pix = jnp.arange(hw, dtype=jnp.int32)
    yc = (pix // w).reshape(1, hw)
    xc = (pix % w).reshape(1, hw)

    if apply_batch_norm:
        # BN needs global N*H*W statistics: fold the batch into the lane axis
        # and run a single grid step so the stats stay exact.
        blocks, L = 1, n * hw
        p1 = p1.transpose(1, 0, 2).reshape(1, 9 * c, L)
        xs = xs.transpose(1, 0, 2).reshape(1, c, L)
        yc = jnp.tile(yc, (1, n))
        xc = jnp.tile(xc, (1, n))
        semantics = ("arbitrary",)
    else:
        blocks, L = n, hw
        semantics = ("parallel",)

    # Weights: HWIO (ky, kx, ci, co) -> (co, 9c) matching the patch layout.
    def wmat(wgt):
        return wgt.astype(jnp.float32).transpose(3, 0, 1, 2).reshape(c, 9 * c)

    def col(v):
        return v.astype(jnp.float32).reshape(c, 1)

    w1m, w2m = wmat(params["w1"]), wmat(params["w2"])
    b1, b2 = col(params["b1"]), col(params["b2"])
    g1, bt1 = col(params["g1"]), col(params["bt1"])
    g2, bt2 = col(params["g2"]), col(params["bt2"])

    kernel = functools.partial(_skip_kernel, bool(apply_batch_norm), h, w)

    def fixed(shape):               # small resident array, same block each step
        return pl.BlockSpec(shape, lambda i: (0,) * len(shape))

    out = pl.pallas_call(
        kernel,
        out_shape=jax.ShapeDtypeStruct((blocks, c, L), jnp.float32),
        grid=(blocks,),
        in_specs=[
            pl.BlockSpec((None, 9 * c, L), lambda i: (i, 0, 0)),   # patches
            pl.BlockSpec((None, c, L), lambda i: (i, 0, 0)),       # skip
            fixed((1, L)), fixed((1, L)),                          # y / x coords
            fixed((c, 9 * c)), fixed((c, 1)),                      # w1, b1
            fixed((c, 9 * c)), fixed((c, 1)),                      # w2, b2
            fixed((c, 1)), fixed((c, 1)),                          # g1, bt1
            fixed((c, 1)), fixed((c, 1)),                          # g2, bt2
        ],
        out_specs=pl.BlockSpec((None, c, L), lambda i: (i, 0, 0)),
        compiler_params=pltpu.CompilerParams(dimension_semantics=semantics),
    )(p1, xs, yc, xc, w1m, b1, w2m, b2, g1, bt1, g2, bt2)

    if apply_batch_norm:
        return out.reshape(c, n, h, w).transpose(1, 0, 2, 3)
    return out.reshape(n, c, h, w)


def reference_forward(x_nchw, params, apply_batch_norm=False):
    """Pure-JAX reference mirroring the PyTorch forward (for verification)."""
    x = jnp.transpose(x_nchw.astype(jnp.float32), (0, 2, 3, 1))

    def conv(v, wgt, b):
        y = lax.conv_general_dilated(v, wgt, (1, 1), "SAME",
                                     dimension_numbers=("NHWC", "HWIO", "NHWC"))
        return y + b

    def bn(v, g, bt):
        mu = jnp.mean(v, axis=(0, 1, 2), keepdims=True)
        var = jnp.mean((v - mu) ** 2, axis=(0, 1, 2), keepdims=True)
        return (v - mu) * lax.rsqrt(var + 1e-5) * g + bt

    out = conv(x, params["w1"], params["b1"])
    if apply_batch_norm:
        out = bn(out, params["g1"], params["bt1"])
    out = jnp.maximum(out, 0.0)
    out = conv(out, params["w2"], params["b2"])
    if apply_batch_norm:
        out = bn(out, params["g2"], params["bt2"])
    out = jnp.maximum(out + x, 0.0)
    return jnp.transpose(out, (0, 3, 1, 2))


if __name__ == "__main__":
    # Full-f32 matmul/conv precision so kernel and reference match tightly.
    jax.config.update("jax_default_matmul_precision", "highest")

    key = jax.random.PRNGKey(0)
    N, C, H, W = 2, 4, 16, 16
    ks = jax.random.split(key, 9)

    x = jax.random.normal(ks[0], (N, C, H, W), jnp.float32)   # PyTorch NCHW input

    # Deterministic synthetic parameters (conv weights kept in HWIO layout).
    params = {
        "w1": 0.1 * jax.random.normal(ks[1], (3, 3, C, C), jnp.float32),
        "b1": 0.1 * jax.random.normal(ks[2], (C,), jnp.float32),
        "w2": 0.1 * jax.random.normal(ks[3], (3, 3, C, C), jnp.float32),
        "b2": 0.1 * jax.random.normal(ks[4], (C,), jnp.float32),
        "g1": 1.0 + 0.1 * jax.random.normal(ks[5], (C,), jnp.float32),
        "bt1": 0.1 * jax.random.normal(ks[6], (C,), jnp.float32),
        "g2": 1.0 + 0.05 * jax.random.normal(ks[7], (C,), jnp.float32),
        "bt2": 0.05 * jax.random.normal(ks[8], (C,), jnp.float32),
    }
    # Note: the PyTorch module's unused `self.outputs = NUM_POSSIBLE_MOVES`
    # attribute does not participate in forward() and is ignored.

    for apply_bn in (False, True):          # default config is False
        out = jax.block_until_ready(simple_skip_layer(x, params, apply_bn))
        ref = jax.block_until_ready(reference_forward(x, params, apply_bn))
        assert out.shape == (N, C, H, W) and out.dtype == jnp.float32
        err = float(jnp.max(jnp.abs(out - ref)))
        assert err < 1e-3, f"mismatch (apply_bn={apply_bn}): max abs err {err}"

    print("KERNEL_OK")
</pallas_src>

<mosaic_0001>
module attributes {stable_mosaic.version = 11 : i64} {
  func.func @_skip_kernel(%arg0: i32, %arg1: memref<1x36x256xf32, #tpu.memory_space<vmem>>, %arg2: memref<1x4x256xf32, #tpu.memory_space<vmem>>, %arg3: memref<1x256xi32, #tpu.memory_space<vmem>>, %arg4: memref<1x256xi32, #tpu.memory_space<vmem>>, %arg5: memref<4x36xf32, #tpu.memory_space<vmem>>, %arg6: memref<4x1xf32, #tpu.memory_space<vmem>>, %arg7: memref<4x36xf32, #tpu.memory_space<vmem>>, %arg8: memref<4x1xf32, #tpu.memory_space<vmem>>, %arg9: memref<4x1xf32, #tpu.memory_space<vmem>>, %arg10: memref<4x1xf32, #tpu.memory_space<vmem>>, %arg11: memref<4x1xf32, #tpu.memory_space<vmem>>, %arg12: memref<4x1xf32, #tpu.memory_space<vmem>>, %arg13: memref<1x4x256xf32, #tpu.memory_space<vmem>>) attributes {dimension_semantics = [#tpu.dimension_semantics<parallel>], iteration_bounds = array<i64: 2>, scalar_prefetch = 0 : i64, scratch_operands = 0 : i64, tpu.core_type = #tpu.core_type<tc>, window_params = [{transform_indices = @transform_0, window_bounds = array<i64: 1, 36, 256>}, {transform_indices = @transform_1, window_bounds = array<i64: 1, 4, 256>}, {pipeline_mode = #tpu.pipeline_mode<synchronous>, transform_indices = @transform_2, window_bounds = array<i64: 1, 256>}, {pipeline_mode = #tpu.pipeline_mode<synchronous>, transform_indices = @transform_3, window_bounds = array<i64: 1, 256>}, {pipeline_mode = #tpu.pipeline_mode<synchronous>, transform_indices = @transform_4, window_bounds = array<i64: 4, 36>}, {pipeline_mode = #tpu.pipeline_mode<synchronous>, transform_indices = @transform_5, window_bounds = array<i64: 4, 1>}, {pipeline_mode = #tpu.pipeline_mode<synchronous>, transform_indices = @transform_6, window_bounds = array<i64: 4, 36>}, {pipeline_mode = #tpu.pipeline_mode<synchronous>, transform_indices = @transform_7, window_bounds = array<i64: 4, 1>}, {pipeline_mode = #tpu.pipeline_mode<synchronous>, transform_indices = @transform_8, window_bounds = array<i64: 4, 1>}, {pipeline_mode = #tpu.pipeline_mode<synchronous>, transform_indices = @transform_9, window_bounds = array<i64: 4, 1>}, {pipeline_mode = #tpu.pipeline_mode<synchronous>, transform_indices = @transform_10, window_bounds = array<i64: 4, 1>}, {pipeline_mode = #tpu.pipeline_mode<synchronous>, transform_indices = @transform_11, window_bounds = array<i64: 4, 1>}, {transform_indices = @transform_12, window_bounds = array<i64: 1, 4, 256>}]} {
    %c0 = arith.constant 0 : index
    %c0_0 = arith.constant 0 : index
    %0 = vector.load %arg5[%c0, %c0_0] : memref<4x36xf32, #tpu.memory_space<vmem>>, vector<4x36xf32>
    %c0_1 = arith.constant 0 : index
    %c0_2 = arith.constant 0 : index
    %c0_3 = arith.constant 0 : index
    %1 = vector.load %arg1[%c0_1, %c0_2, %c0_3] : memref<1x36x256xf32, #tpu.memory_space<vmem>>, vector<1x36x256xf32>
    %2 = vector.shape_cast %1 : vector<1x36x256xf32> to vector<36x256xf32>
    %cst = arith.constant dense<0.000000e+00> : vector<4x256xf32>
    %3 = tpu.matmul %0, %2, %cst {dimension_numbers = #tpu.dot_dimension_numbers<[1], [0], [0], [1], [0, 0, 1, 1], [], []>, precision = #tpu.contract_precision<fp32>} : vector<4x36xf32>, vector<36x256xf32>, vector<4x256xf32> -> vector<4x256xf32>
    %c0_4 = arith.constant 0 : index
    %c0_5 = arith.constant 0 : index
    %4 = vector.load %arg6[%c0_4, %c0_5] : memref<4x1xf32, #tpu.memory_space<vmem>>, vector<4x1xf32>
    %5 = vector.broadcast %4 : vector<4x1xf32> to vector<4x256xf32>
    %6 = arith.addf %3, %5 : vector<4x256xf32>
    %cst_6 = arith.constant 0.000000e+00 : f32
    %7 = vector.broadcast %cst_6 : f32 to vector<4x256xf32>
    %8 = arith.maximumf %6, %7 : vector<4x256xf32>
    %c0_7 = arith.constant 0 : index
    %c0_8 = arith.constant 0 : index
    %9 = vector.load %arg3[%c0_7, %c0_8] : memref<1x256xi32, #tpu.memory_space<vmem>>, vector<1x256xi32>
    %c0_9 = arith.constant 0 : index
    %c0_10 = arith.constant 0 : index
    %10 = vector.load %arg4[%c0_9, %c0_10] : memref<1x256xi32, #tpu.memory_space<vmem>>, vector<1x256xi32>
    %c17_i32 = arith.constant 17 : i32
    %11 = tpu.dynamic_rotate %8 by %c17_i32 dim 1 : vector<4x256xf32>, i32 -> vector<4x256xf32>
    %c-1_i32 = arith.constant -1 : i32
    %12 = vector.broadcast %c-1_i32 : i32 to vector<1x256xi32>
    %13 = arith.addi %9, %12 : vector<1x256xi32>
    %c0_i32 = arith.constant 0 : i32
    %14 = vector.broadcast %c0_i32 : i32 to vector<1x256xi32>
    %15 = arith.cmpi sge, %13, %14 : vector<1x256xi32>
    %c-1_i32_11 = arith.constant -1 : i32
    %16 = vector.broadcast %c-1_i32_11 : i32 to vector<1x256xi32>
    %17 = arith.addi %9, %16 : vector<1x256xi32>
    %c16_i32 = arith.constant 16 : i32
    %18 = vector.broadcast %c16_i32 : i32 to vector<1x256xi32>
    %19 = arith.cmpi slt, %17, %18 : vector<1x256xi32>
    %20 = arith.andi %15, %19 : vector<1x256xi1>
    %c-1_i32_12 = arith.constant -1 : i32
    %21 = vector.broadcast %c-1_i32_12 : i32 to vector<1x256xi32>
    %22 = arith.addi %10, %21 : vector<1x256xi32>
    %c0_i32_13 = arith.constant 0 : i32
    %23 = vector.broadcast %c0_i32_13 : i32 to vector<1x256xi32>
    %24 = arith.cmpi sge, %22, %23 : vector<1x256xi32>
    %25 = arith.andi %20, %24 : vector<1x256xi1>
    %c-1_i32_14 = arith.constant -1 : i32
    %26 = vector.broadcast %c-1_i32_14 : i32 to vector<1x256xi32>
    %27 = arith.addi %10, %26 : vector<1x256xi32>
    %c16_i32_15 = arith.constant 16 : i32
    %28 = vector.broadcast %c16_i32_15 : i32 to vector<1x256xi32>
    %29 = arith.cmpi slt, %27, %28 : vector<1x256xi32>
    %30 = arith.andi %25, %29 : vector<1x256xi1>
    %cst_16 = arith.constant 0.000000e+00 : f32
    %31 = vector.shape_cast %30 : vector<1x256xi1> to vector<1x256xi1>
    %32 = vector.broadcast %31 : vector<1x256xi1> to vector<4x256xi1>
    %33 = vector.broadcast %cst_16 : f32 to vector<4x256xf32>
    %34 = arith.select %32, %11, %33 : vector<4x256xi1>, vector<4x256xf32>
    %c16_i32_17 = arith.constant 16 : i32
    %35 = tpu.dynamic_rotate %8 by %c16_i32_17 dim 1 : vector<4x256xf32>, i32 -> vector<4x256xf32>
    %c-1_i32_18 = arith.constant -1 : i32
    %36 = vector.broadcast %c-1_i32_18 : i32 to vector<1x256xi32>
    %37 = arith.addi %9, %36 : vector<1x256xi32>
    %c0_i32_19 = arith.constant 0 : i32
    %38 = vector.broadcast %c0_i32_19 : i32 to vector<1x256xi32>
    %39 = arith.cmpi sge, %37, %38 : vector<1x256xi32>
    %c-1_i32_20 = arith.constant -1 : i32
    %40 = vector.broadcast %c-1_i32_20 : i32 to vector<1x256xi32>
    %41 = arith.addi %9, %40 : vector<1x256xi32>
    %c16_i32_21 = arith.constant 16 : i32
    %42 = vector.broadcast %c16_i32_21 : i32 to vector<1x256xi32>
    %43 = arith.cmpi slt, %41, %42 : vector<1x256xi32>
    %44 = arith.andi %39, %43 : vector<1x256xi1>
    %c0_i32_22 = arith.constant 0 : i32
    %45 = vector.broadcast %c0_i32_22 : i32 to vector<1x256xi32>
    %46 = arith.addi %10, %45 : vector<1x256xi32>
    %c0_i32_23 = arith.constant 0 : i32
    %47 = vector.broadcast %c0_i32_23 : i32 to vector<1x256xi32>
    %48 = arith.cmpi sge, %46, %47 : vector<1x256xi32>
    %49 = arith.andi %44, %48 : vector<1x256xi1>
    %c0_i32_24 = arith.constant 0 : i32
    %50 = vector.broadcast %c0_i32_24 : i32 to vector<1x256xi32>
    %51 = arith.addi %10, %50 : vector<1x256xi32>
    %c16_i32_25 = arith.constant 16 : i32
    %52 = vector.broadcast %c16_i32_25 : i32 to vector<1x256xi32>
    %53 = arith.cmpi slt, %51, %52 : vector<1x256xi32>
    %54 = arith.andi %49, %53 : vector<1x256xi1>
    %cst_26 = arith.constant 0.000000e+00 : f32
    %55 = vector.shape_cast %54 : vector<1x256xi1> to vector<1x256xi1>
    %56 = vector.broadcast %55 : vector<1x256xi1> to vector<4x256xi1>
    %57 = vector.broadcast %cst_26 : f32 to vector<4x256xf32>
    %58 = arith.select %56, %35, %57 : vector<4x256xi1>, vector<4x256xf32>
    %c15_i32 = arith.constant 15 : i32
    %59 = tpu.dynamic_rotate %8 by %c15_i32 dim 1 : vector<4x256xf32>, i32 -> vector<4x256xf32>
    %c-1_i32_27 = arith.constant -1 : i32
    %60 = vector.broadcast %c-1_i32_27 : i32 to vector<1x256xi32>
    %61 = arith.addi %9, %60 : vector<1x256xi32>
    %c0_i32_28 = arith.constant 0 : i32
    %62 = vector.broadcast %c0_i32_28 : i32 to vector<1x256xi32>
    %63 = arith.cmpi sge, %61, %62 : vector<1x256xi32>
    %c-1_i32_29 = arith.constant -1 : i32
    %64 = vector.broadcast %c-1_i32_29 : i32 to vector<1x256xi32>
    %65 = arith.addi %9, %64 : vector<1x256xi32>
    %c16_i32_30 = arith.constant 16 : i32
    %66 = vector.broadcast %c16_i32_30 : i32 to vector<1x256xi32>
    %67 = arith.cmpi slt, %65, %66 : vector<1x256xi32>
    %68 = arith.andi %63, %67 : vector<1x256xi1>
    %c1_i32 = arith.constant 1 : i32
    %69 = vector.broadcast %c1_i32 : i32 to vector<1x256xi32>
    %70 = arith.addi %10, %69 : vector<1x256xi32>
    %c0_i32_31 = arith.constant 0 : i32
    %71 = vector.broadcast %c0_i32_31 : i32 to vector<1x256xi32>
    %72 = arith.cmpi sge, %70, %71 : vector<1x256xi32>
    %73 = arith.andi %68, %72 : vector<1x256xi1>
    %c1_i32_32 = arith.constant 1 : i32
    %74 = vector.broadcast %c1_i32_32 : i32 to vector<1x256xi32>
    %75 = arith.addi %10, %74 : vector<1x256xi32>
    %c16_i32_33 = arith.constant 16 : i32
    %76 = vector.broadcast %c16_i32_33 : i32 to vector<1x256xi32>
    %77 = arith.cmpi slt, %75, %76 : vector<1x256xi32>
    %78 = arith.andi %73, %77 : vector<1x256xi1>
    %cst_34 = arith.constant 0.000000e+00 : f32
    %79 = vector.shape_cast %78 : vector<1x256xi1> to vector<1x256xi1>
    %80 = vector.broadcast %79 : vector<1x256xi1> to vector<4x256xi1>
    %81 = vector.broadcast %cst_34 : f32 to vector<4x256xf32>
    %82 = arith.select %80, %59, %81 : vector<4x256xi1>, vector<4x256xf32>
    %c1_i32_35 = arith.constant 1 : i32
    %83 = tpu.dynamic_rotate %8 by %c1_i32_35 dim 1 : vector<4x256xf32>, i32 -> vector<4x256xf32>
    %c0_i32_36 = arith.constant 0 : i32
    %84 = vector.broadcast %c0_i32_36 : i32 to vector<1x256xi32>
    %85 = arith.addi %9, %84 : vector<1x256xi32>
    %c0_i32_37 = arith.constant 0 : i32
    %86 = vector.broadcast %c0_i32_37 : i32 to vector<1x256xi32>
    %87 = arith.cmpi sge, %85, %86 : vector<1x256xi32>
    %c0_i32_38 = arith.constant 0 : i32
    %88 = vector.broadcast %c0_i32_38 : i32 to vector<1x256xi32>
    %89 = arith.addi %9, %88 : vector<1x256xi32>
    %c16_i32_39 = arith.constant 16 : i32
    %90 = vector.broadcast %c16_i32_39 : i32 to vector<1x256xi32>
    %91 = arith.cmpi slt, %89, %90 : vector<1x256xi32>
    %92 = arith.andi %87, %91 : vector<1x256xi1>
    %c-1_i32_40 = arith.constant -1 : i32
    %93 = vector.broadcast %c-1_i32_40 : i32 to vector<1x256xi32>
    %94 = arith.addi %10, %93 : vector<1x256xi32>
    %c0_i32_41 = arith.constant 0 : i32
    %95 = vector.broadcast %c0_i32_41 : i32 to vector<1x256xi32>
    %96 = arith.cmpi sge, %94, %95 : vector<1x256xi32>
    %97 = arith.andi %92, %96 : vector<1x256xi1>
    %c-1_i32_42 = arith.constant -1 : i32
    %98 = vector.broadcast %c-1_i32_42 : i32 to vector<1x256xi32>
    %99 = arith.addi %10, %98 : vector<1x256xi32>
    %c16_i32_43 = arith.constant 16 : i32
    %100 = vector.broadcast %c16_i32_43 : i32 to vector<1x256xi32>
    %101 = arith.cmpi slt, %99, %100 : vector<1x256xi32>
    %102 = arith.andi %97, %101 : vector<1x256xi1>
    %cst_44 = arith.constant 0.000000e+00 : f32
    %103 = vector.shape_cast %102 : vector<1x256xi1> to vector<1x256xi1>
    %104 = vector.broadcast %103 : vector<1x256xi1> to vector<4x256xi1>
    %105 = vector.broadcast %cst_44 : f32 to vector<4x256xf32>
    %106 = arith.select %104, %83, %105 : vector<4x256xi1>, vector<4x256xf32>
    %c0_i32_45 = arith.constant 0 : i32
    %107 = vector.broadcast %c0_i32_45 : i32 to vector<1x256xi32>
    %108 = arith.addi %9, %107 : vector<1x256xi32>
    %c0_i32_46 = arith.constant 0 : i32
    %109 = vector.broadcast %c0_i32_46 : i32 to vector<1x256xi32>
    %110 = arith.cmpi sge, %108, %109 : vector<1x256xi32>
    %c0_i32_47 = arith.constant 0 : i32
    %111 = vector.broadcast %c0_i32_47 : i32 to vector<1x256xi32>
    %112 = arith.addi %9, %111 : vector<1x256xi32>
    %c16_i32_48 = arith.constant 16 : i32
    %113 = vector.broadcast %c16_i32_48 : i32 to vector<1x256xi32>
    %114 = arith.cmpi slt, %112, %113 : vector<1x256xi32>
    %115 = arith.andi %110, %114 : vector<1x256xi1>
    %c0_i32_49 = arith.constant 0 : i32
    %116 = vector.broadcast %c0_i32_49 : i32 to vector<1x256xi32>
    %117 = arith.addi %10, %116 : vector<1x256xi32>
    %c0_i32_50 = arith.constant 0 : i32
    %118 = vector.broadcast %c0_i32_50 : i32 to vector<1x256xi32>
    %119 = arith.cmpi sge, %117, %118 : vector<1x256xi32>
    %120 = arith.andi %115, %119 : vector<1x256xi1>
    %c0_i32_51 = arith.constant 0 : i32
    %121 = vector.broadcast %c0_i32_51 : i32 to vector<1x256xi32>
    %122 = arith.addi %10, %121 : vector<1x256xi32>
    %c16_i32_52 = arith.constant 16 : i32
    %123 = vector.broadcast %c16_i32_52 : i32 to vector<1x256xi32>
    %124 = arith.cmpi slt, %122, %123 : vector<1x256xi32>
    %125 = arith.andi %120, %124 : vector<1x256xi1>
    %cst_53 = arith.constant 0.000000e+00 : f32
    %126 = vector.shape_cast %125 : vector<1x256xi1> to vector<1x256xi1>
    %127 = vector.broadcast %126 : vector<1x256xi1> to vector<4x256xi1>
    %128 = vector.broadcast %cst_53 : f32 to vector<4x256xf32>
    %129 = arith.select %127, %8, %128 : vector<4x256xi1>, vector<4x256xf32>
    %c255_i32 = arith.constant 255 : i32
    %130 = tpu.dynamic_rotate %8 by %c255_i32 dim 1 : vector<4x256xf32>, i32 -> vector<4x256xf32>
    %c0_i32_54 = arith.constant 0 : i32
    %131 = vector.broadcast %c0_i32_54 : i32 to vector<1x256xi32>
    %132 = arith.addi %9, %131 : vector<1x256xi32>
    %c0_i32_55 = arith.constant 0 : i32
    %133 = vector.broadcast %c0_i32_55 : i32 to vector<1x256xi32>
    %134 = arith.cmpi sge, %132, %133 : vector<1x256xi32>
    %c0_i32_56 = arith.constant 0 : i32
    %135 = vector.broadcast %c0_i32_56 : i32 to vector<1x256xi32>
    %136 = arith.addi %9, %135 : vector<1x256xi32>
    %c16_i32_57 = arith.constant 16 : i32
    %137 = vector.broadcast %c16_i32_57 : i32 to vector<1x256xi32>
    %138 = arith.cmpi slt, %136, %137 : vector<1x256xi32>
    %139 = arith.andi %134, %138 : vector<1x256xi1>
    %c1_i32_58 = arith.constant 1 : i32
    %140 = vector.broadcast %c1_i32_58 : i32 to vector<1x256xi32>
    %141 = arith.addi %10, %140 : vector<1x256xi32>
    %c0_i32_59 = arith.constant 0 : i32
    %142 = vector.broadcast %c0_i32_59 : i32 to vector<1x256xi32>
    %143 = arith.cmpi sge, %141, %142 : vector<1x256xi32>
    %144 = arith.andi %139, %143 : vector<1x256xi1>
    %c1_i32_60 = arith.constant 1 : i32
    %145 = vector.broadcast %c1_i32_60 : i32 to vector<1x256xi32>
    %146 = arith.addi %10, %145 : vector<1x256xi32>
    %c16_i32_61 = arith.constant 16 : i32
    %147 = vector.broadcast %c16_i32_61 : i32 to vector<1x256xi32>
    %148 = arith.cmpi slt, %146, %147 : vector<1x256xi32>
    %149 = arith.andi %144, %148 : vector<1x256xi1>
    %cst_62 = arith.constant 0.000000e+00 : f32
    %150 = vector.shape_cast %149 : vector<1x256xi1> to vector<1x256xi1>
    %151 = vector.broadcast %150 : vector<1x256xi1> to vector<4x256xi1>
    %152 = vector.broadcast %cst_62 : f32 to vector<4x256xf32>
    %153 = arith.select %151, %130, %152 : vector<4x256xi1>, vector<4x256xf32>
    %c241_i32 = arith.constant 241 : i32
    %154 = tpu.dynamic_rotate %8 by %c241_i32 dim 1 : vector<4x256xf32>, i32 -> vector<4x256xf32>
    %c1_i32_63 = arith.constant 1 : i32
    %155 = vector.broadcast %c1_i32_63 : i32 to vector<1x256xi32>
    %156 = arith.addi %9, %155 : vector<1x256xi32>
    %c0_i32_64 = arith.constant 0 : i32
    %157 = vector.broadcast %c0_i32_64 : i32 to vector<1x256xi32>
    %158 = arith.cmpi sge, %156, %157 : vector<1x256xi32>
    %c1_i32_65 = arith.constant 1 : i32
    %159 = vector.broadcast %c1_i32_65 : i32 to vector<1x256xi32>
    %160 = arith.addi %9, %159 : vector<1x256xi32>
    %c16_i32_66 = arith.constant 16 : i32
    %161 = vector.broadcast %c16_i32_66 : i32 to vector<1x256xi32>
    %162 = arith.cmpi slt, %160, %161 : vector<1x256xi32>
    %163 = arith.andi %158, %162 : vector<1x256xi1>
    %c-1_i32_67 = arith.constant -1 : i32
    %164 = vector.broadcast %c-1_i32_67 : i32 to vector<1x256xi32>
    %165 = arith.addi %10, %164 : vector<1x256xi32>
    %c0_i32_68 = arith.constant 0 : i32
    %166 = vector.broadcast %c0_i32_68 : i32 to vector<1x256xi32>
    %167 = arith.cmpi sge, %165, %166 : vector<1x256xi32>
    %168 = arith.andi %163, %167 : vector<1x256xi1>
    %c-1_i32_69 = arith.constant -1 : i32
    %169 = vector.broadcast %c-1_i32_69 : i32 to vector<1x256xi32>
    %170 = arith.addi %10, %169 : vector<1x256xi32>
    %c16_i32_70 = arith.constant 16 : i32
    %171 = vector.broadcast %c16_i32_70 : i32 to vector<1x256xi32>
    %172 = arith.cmpi slt, %170, %171 : vector<1x256xi32>
    %173 = arith.andi %168, %172 : vector<1x256xi1>
    %cst_71 = arith.constant 0.000000e+00 : f32
    %174 = vector.shape_cast %173 : vector<1x256xi1> to vector<1x256xi1>
    %175 = vector.broadcast %174 : vector<1x256xi1> to vector<4x256xi1>
    %176 = vector.broadcast %cst_71 : f32 to vector<4x256xf32>
    %177 = arith.select %175, %154, %176 : vector<4x256xi1>, vector<4x256xf32>
    %c240_i32 = arith.constant 240 : i32
    %178 = tpu.dynamic_rotate %8 by %c240_i32 dim 1 : vector<4x256xf32>, i32 -> vector<4x256xf32>
    %c1_i32_72 = arith.constant 1 : i32
    %179 = vector.broadcast %c1_i32_72 : i32 to vector<1x256xi32>
    %180 = arith.addi %9, %179 : vector<1x256xi32>
    %c0_i32_73 = arith.constant 0 : i32
    %181 = vector.broadcast %c0_i32_73 : i32 to vector<1x256xi32>
    %182 = arith.cmpi sge, %180, %181 : vector<1x256xi32>
    %c1_i32_74 = arith.constant 1 : i32
    %183 = vector.broadcast %c1_i32_74 : i32 to vector<1x256xi32>
    %184 = arith.addi %9, %183 : vector<1x256xi32>
    %c16_i32_75 = arith.constant 16 : i32
    %185 = vector.broadcast %c16_i32_75 : i32 to vector<1x256xi32>
    %186 = arith.cmpi slt, %184, %185 : vector<1x256xi32>
    %187 = arith.andi %182, %186 : vector<1x256xi1>
    %c0_i32_76 = arith.constant 0 : i32
    %188 = vector.broadcast %c0_i32_76 : i32 to vector<1x256xi32>
    %189 = arith.addi %10, %188 : vector<1x256xi32>
    %c0_i32_77 = arith.constant 0 : i32
    %190 = vector.broadcast %c0_i32_77 : i32 to vector<1x256xi32>
    %191 = arith.cmpi sge, %189, %190 : vector<1x256xi32>
    %192 = arith.andi %187, %191 : vector<1x256xi1>
    %c0_i32_78 = arith.constant 0 : i32
    %193 = vector.broadcast %c0_i32_78 : i32 to vector<1x256xi32>
    %194 = arith.addi %10, %193 : vector<1x256xi32>
    %c16_i32_79 = arith.constant 16 : i32
    %195 = vector.broadcast %c16_i32_79 : i32 to vector<1x256xi32>
    %196 = arith.cmpi slt, %194, %195 : vector<1x256xi32>
    %197 = arith.andi %192, %196 : vector<1x256xi1>
    %cst_80 = arith.constant 0.000000e+00 : f32
    %198 = vector.shape_cast %197 : vector<1x256xi1> to vector<1x256xi1>
    %199 = vector.broadcast %198 : vector<1x256xi1> to vector<4x256xi1>
    %200 = vector.broadcast %cst_80 : f32 to vector<4x256xf32>
    %201 = arith.select %199, %178, %200 : vector<4x256xi1>, vector<4x256xf32>
    %c239_i32 = arith.constant 239 : i32
    %202 = tpu.dynamic_rotate %8 by %c239_i32 dim 1 : vector<4x256xf32>, i32 -> vector<4x256xf32>
    %c1_i32_81 = arith.constant 1 : i32
    %203 = vector.broadcast %c1_i32_81 : i32 to vector<1x256xi32>
    %204 = arith.addi %9, %203 : vector<1x256xi32>
    %c0_i32_82 = arith.constant 0 : i32
    %205 = vector.broadcast %c0_i32_82 : i32 to vector<1x256xi32>
    %206 = arith.cmpi sge, %204, %205 : vector<1x256xi32>
    %c1_i32_83 = arith.constant 1 : i32
    %207 = vector.broadcast %c1_i32_83 : i32 to vector<1x256xi32>
    %208 = arith.addi %9, %207 : vector<1x256xi32>
    %c16_i32_84 = arith.constant 16 : i32
    %209 = vector.broadcast %c16_i32_84 : i32 to vector<1x256xi32>
    %210 = arith.cmpi slt, %208, %209 : vector<1x256xi32>
    %211 = arith.andi %206, %210 : vector<1x256xi1>
    %c1_i32_85 = arith.constant 1 : i32
    %212 = vector.broadcast %c1_i32_85 : i32 to vector<1x256xi32>
    %213 = arith.addi %10, %212 : vector<1x256xi32>
    %c0_i32_86 = arith.constant 0 : i32
    %214 = vector.broadcast %c0_i32_86 : i32 to vector<1x256xi32>
    %215 = arith.cmpi sge, %213, %214 : vector<1x256xi32>
    %216 = arith.andi %211, %215 : vector<1x256xi1>
    %c1_i32_87 = arith.constant 1 : i32
    %217 = vector.broadcast %c1_i32_87 : i32 to vector<1x256xi32>
    %218 = arith.addi %10, %217 : vector<1x256xi32>
    %c16_i32_88 = arith.constant 16 : i32
    %219 = vector.broadcast %c16_i32_88 : i32 to vector<1x256xi32>
    %220 = arith.cmpi slt, %218, %219 : vector<1x256xi32>
    %221 = arith.andi %216, %220 : vector<1x256xi1>
    %cst_89 = arith.constant 0.000000e+00 : f32
    %222 = vector.shape_cast %221 : vector<1x256xi1> to vector<1x256xi1>
    %223 = vector.broadcast %222 : vector<1x256xi1> to vector<4x256xi1>
    %224 = vector.broadcast %cst_89 : f32 to vector<4x256xf32>
    %225 = arith.select %223, %202, %224 : vector<4x256xi1>, vector<4x256xf32>
    %226 = tpu.concatenate %34, %58, %82, %106, %129, %153, %177, %201, %225 in 0 : vector<4x256xf32>, vector<4x256xf32>, vector<4x256xf32>, vector<4x256xf32>, vector<4x256xf32>, vector<4x256xf32>, vector<4x256xf32>, vector<4x256xf32>, vector<4x256xf32> -> vector<36x256xf32>
    %c0_90 = arith.constant 0 : index
    %c0_91 = arith.constant 0 : index
    %227 = vector.load %arg7[%c0_90, %c0_91] : memref<4x36xf32, #tpu.memory_space<vmem>>, vector<4x36xf32>
    %cst_92 = arith.constant dense<0.000000e+00> : vector<4x256xf32>
    %228 = tpu.matmul %227, %226, %cst_92 {dimension_numbers = #tpu.dot_dimension_numbers<[1], [0], [0], [1], [0, 0, 1, 1], [], []>, precision = #tpu.contract_precision<fp32>} : vector<4x36xf32>, vector<36x256xf32>, vector<4x256xf32> -> vector<4x256xf32>
    %c0_93 = arith.constant 0 : index
    %c0_94 = arith.constant 0 : index
    %229 = vector.load %arg8[%c0_93, %c0_94] : memref<4x1xf32, #tpu.memory_space<vmem>>, vector<4x1xf32>
    %230 = vector.broadcast %229 : vector<4x1xf32> to vector<4x256xf32>
    %231 = arith.addf %228, %230 : vector<4x256xf32>
    %c0_95 = arith.constant 0 : index
    %c0_96 = arith.constant 0 : index
    %c0_97 = arith.constant 0 : index
    %232 = vector.load %arg2[%c0_95, %c0_96, %c0_97] : memref<1x4x256xf32, #tpu.memory_space<vmem>>, vector<1x4x256xf32>
    %233 = vector.shape_cast %232 : vector<1x4x256xf32> to vector<4x256xf32>
    %234 = arith.addf %231, %233 : vector<4x256xf32>
    %cst_98 = arith.constant 0.000000e+00 : f32
    %235 = vector.broadcast %cst_98 : f32 to vector<4x256xf32>
    %236 = arith.maximumf %234, %235 : vector<4x256xf32>
    %c0_99 = arith.constant 0 : index
    %c0_100 = arith.constant 0 : index
    %c0_101 = arith.constant 0 : index
    %237 = vector.load %arg13[%c0_99, %c0_100, %c0_101] : memref<1x4x256xf32, #tpu.memory_space<vmem>>, vector<1x4x256xf32>
    %238 = vector.shape_cast %237 : vector<1x4x256xf32> to vector<4x256xf32>
    %239 = vector.shape_cast %236 : vector<4x256xf32> to vector<1x4x256xf32>
    tpu.vector_store %arg13[%c0_99, %c0_100, %c0_101], %239 {strides = array<i32>} : memref<1x4x256xf32, #tpu.memory_space<vmem>>, vector<1x4x256xf32>,
    return
  }
  func.func @transform_0(%arg0: i32) -> (i32, i32, i32) {
    %c0_i32 = arith.constant 0 : i32
    %c0_i32_0 = arith.constant 0 : i32
    %c0_i32_1 = arith.constant 0 : i32
    return %arg0, %c0_i32, %c0_i32_0 : i32, i32, i32
  }
  func.func @transform_1(%arg0: i32) -> (i32, i32, i32) {
    %c0_i32 = arith.constant 0 : i32
    %c0_i32_0 = arith.constant 0 : i32
    %c0_i32_1 = arith.constant 0 : i32
    return %arg0, %c0_i32, %c0_i32_0 : i32, i32, i32
  }
  func.func @transform_2(%arg0: i32) -> (i32, i32) {
    %c0_i32 = arith.constant 0 : i32
    %c0_i32_0 = arith.constant 0 : i32
    %c0_i32_1 = arith.constant 0 : i32
    return %c0_i32, %c0_i32_0 : i32, i32
  }
  func.func @transform_3(%arg0: i32) -> (i32, i32) {
    %c0_i32 = arith.constant 0 : i32
    %c0_i32_0 = arith.constant 0 : i32
    %c0_i32_1 = arith.constant 0 : i32
    return %c0_i32, %c0_i32_0 : i32, i32
  }
  func.func @transform_4(%arg0: i32) -> (i32, i32) {
    %c0_i32 = arith.constant 0 : i32
    %c0_i32_0 = arith.constant 0 : i32
    %c0_i32_1 = arith.constant 0 : i32
    return %c0_i32, %c0_i32_0 : i32, i32
  }
  func.func @transform_5(%arg0: i32) -> (i32, i32) {
    %c0_i32 = arith.constant 0 : i32
    %c0_i32_0 = arith.constant 0 : i32
    %c0_i32_1 = arith.constant 0 : i32
    return %c0_i32, %c0_i32_0 : i32, i32
  }
  func.func @transform_6(%arg0: i32) -> (i32, i32) {
    %c0_i32 = arith.constant 0 : i32
    %c0_i32_0 = arith.constant 0 : i32
    %c0_i32_1 = arith.constant 0 : i32
    return %c0_i32, %c0_i32_0 : i32, i32
  }
  func.func @transform_7(%arg0: i32) -> (i32, i32) {
    %c0_i32 = arith.constant 0 : i32
    %c0_i32_0 = arith.constant 0 : i32
    %c0_i32_1 = arith.constant 0 : i32
    return %c0_i32, %c0_i32_0 : i32, i32
  }
  func.func @transform_8(%arg0: i32) -> (i32, i32) {
    %c0_i32 = arith.constant 0 : i32
    %c0_i32_0 = arith.constant 0 : i32
    %c0_i32_1 = arith.constant 0 : i32
    return %c0_i32, %c0_i32_0 : i32, i32
  }
  func.func @transform_9(%arg0: i32) -> (i32, i32) {
    %c0_i32 = arith.constant 0 : i32
    %c0_i32_0 = arith.constant 0 : i32
    %c0_i32_1 = arith.constant 0 : i32
    return %c0_i32, %c0_i32_0 : i32, i32
  }
  func.func @transform_10(%arg0: i32) -> (i32, i32) {
    %c0_i32 = arith.constant 0 : i32
    %c0_i32_0 = arith.constant 0 : i32
    %c0_i32_1 = arith.constant 0 : i32
    return %c0_i32, %c0_i32_0 : i32, i32
  }
  func.func @transform_11(%arg0: i32) -> (i32, i32) {
    %c0_i32 = arith.constant 0 : i32
    %c0_i32_0 = arith.constant 0 : i32
    %c0_i32_1 = arith.constant 0 : i32
    return %c0_i32, %c0_i32_0 : i32, i32
  }
  func.func @transform_12(%arg0: i32) -> (i32, i32, i32) {
    %c0_i32 = arith.constant 0 : i32
    %c0_i32_0 = arith.constant 0 : i32
    %c0_i32_1 = arith.constant 0 : i32
    return %arg0, %c0_i32, %c0_i32_0 : i32, i32, i32
  }
}

</mosaic_0001>

<bundles_post_ra>
// kernel: tpu_custom_call.1
= control target key start
LH: loop header
LB: loop body
LE: loop exit
PB: predicated region body
PF: predicated region fallthrough
CT: control target
= control target key end

     0   :  { %17 = vsyncpa [#allocation3], 0  ;;  %s2923_s0 = inlined_call_operand.vmem [shape: f32[2,36,256], index: 0, kind: input, shape index: {}]   ;;  %s2924_s1 = inlined_call_operand.vmem [shape: f32[2,4,256], index: 1, kind: input, shape index: {}]   ;;  %s2925_s2 = inlined_call_operand.vmem [shape: s32[1,256], index: 2, kind: input, shape index: {}]   ;;  %s2926_s3 = inlined_call_operand.vmem [shape: s32[1,256], index: 3, kind: input, shape index: {}]   ;;  %s2927_s4 = inlined_call_operand.vmem [shape: f32[4,36], index: 4, kind: input, shape index: {}]   ;;  %s2928_s5 = inlined_call_operand.vmem [shape: f32[4,1], index: 5, kind: input, shape index: {}]   ;;  %s2929_s6 = inlined_call_operand.vmem [shape: f32[4,36], index: 6, kind: input, shape index: {}]   ;;  %s2930_s7 = inlined_call_operand.vmem [shape: f32[4,1], index: 7, kind: input, shape index: {}]   ;;  %s2931_s8 = inlined_call_operand.vmem [shape: f32[4,1], index: 8, kind: input, shape index: {}]   ;;  %s2932_s9 = inlined_call_operand.vmem [shape: f32[4,1], index: 9, kind: input, shape index: {}]   ;;  %s2933_s10 = inlined_call_operand.vmem [shape: f32[4,1], index: 10, kind: input, shape index: {}]   ;;  %s2934_s11 = inlined_call_operand.vmem [shape: f32[4,1], index: 11, kind: input, shape index: {}]   ;;  %s2935_s12 = inlined_call_operand.hbm [shape: f32[2,4,256], index: 12, kind: output, shape index: {}]  }
   0x1   :  { %19 = vsyncpa [#allocation3 + $0x1], 0  ;;  %s2167_s21 = smov 0   ;;  %s2169_s22 = smov 0  }
   0x2   :  { %s2171_s23 = smov 0   ;;  %s2173_s8 = smov 0  }
   0x3 LB: > { %s2188_s9 = sadd.s32 4294967295, %s2089_s8   ;;  %s1961_s10 = sadd.s32 4294967294, %s2089_s8   ;;  %s2089_s8 = sphi %s2173_s8, %s3013_s8   ;;  %s2085_s23 = sphi %s2171_s23, %s3012_s23   ;;  %s2081_s22 = sphi %s2169_s22, %s3011_s22   ;;  %s2077_s21 = sphi %s2167_s21, %s3010_s21  }
   0x4   : > { %s2192_s11 = sadd.s32 1, %s2089_s8   ;;  %s294_s24 = sadd.s32 1, %s2085_s23 }
   0x5   : > { %s291_s25 = ssub.s32 %s2089_s8, %s2192_s11  ;;  %p304_p0 = scmp.ne.s32.totalorder %s2085_s23, %s2081_s22 }
   0x6   : > { %p292_p1 = scmp.eq.s32.totalorder %s291_s25, 0  ;;  %p305_p2 = scmp.eq.s32.totalorder %s2188_s9, 1 }
   0x7   : > { %p310_p3 = scmp.ne.s32.totalorder %s2081_s22, %s2077_s21  ;;  %p311_p4 = scmp.eq.s32.totalorder %s1961_s10, 1 }
   0x8   : > { %s2203_s26 = scalar_select %p292_p1, %s2085_s23, %s294_s24  }
   0x9   : > { %p2205_p5 = por %p305_p2, %p304_p0  ;;  %p2209_p6 = por %p311_p4, %p310_p3 }
   0xa   : > { %p1964_p7 = scmp.ge.s32.totalorder %s2089_s8, 1  ;;  %p375_p8 = scmp.lt.s32.totalorder %s2089_s8, 3 }
   0xc   : > { %p376_p9 = pnand %p1964_p7, %p375_p8 }
   0xd   : > { %p422_p10 = scmp.lt.s32.totalorder (!%p376_p9), %s2188_s9, 1  ;;  %s2093_s20 = smov (!%p376_p9), 111  }
   0xe   : > { %379 = sbr.rel (%p376_p9) target bundleno = 665 (0x299), region = 68  ;;  %s2094_s10 = smov (!%p376_p9), 112  }
   0xf   : > { %s2095_s24 = smov (!%p376_p9), 127   ;;  %s2096_s25 = smov (!%p376_p9), 113  }
  0x10   : > { %s2097_s29 = smov (!%p376_p9), 1   ;;  %s2098_s30 = smov (!%p376_p9), 16  }
  0x11   : > { %s2099_s13 = smov (!%p376_p9), 15   ;;  %s2100_s14 = smov (!%p376_p9), 17  }
  0x13   : > { %v432_v0 = vld [vmem:[%s2927_s4] sm:$0xf]  ;;  %vm449_vm0 = vcmask 293888   ;;  %v2091_v1 = vmov 0.0   ;;  %s2226_s15 = scalar_select %p422_p10, %s2188_s9, 1  ;;  %v2092_v5 = vmov 0  }
  0x14   : > { %534 = vmatprep.mubr.f32.mxu0 %v2091_v1  ;;  %v451_v2 = vsel %vm449_vm0, %v432_v0, 0  ;;  %660 = vmatprep.mubr.f32.mxu1 %v2091_v1  ;;  %v443_v3 = vld [vmem:[%s2928_s5] sm:$0xf]  ;;  %vm2936_vm1 = vcmask 1043456  }
  0x15   : > { %v2228_v4 = vand.u32 4294901760, %v451_v2  ;;  %2026 = vset.pattern.permute.xlu0 %v2092_v5  ;;  %2027 = vset.pattern.permute.xlu1 %v2092_v5  ;;  %s1976_s16 = smul.u32 80, %s2226_s15 }
  0x16   : > { %446 = vperm.xlu0 %2026, %v443_v3  }
  0x17   : > { %v2234_v6 = vsub.f32 %v451_v2, %v2228_v4  ;;  %s426_s19 = scalar_lea.vmem %s2923_s0, %s1976_s16  ;;  %s419_s16 = sand.u32 1, %s2081_s22  }
  0x18   : > { %v442_v7 = vld [vmem:[%s426_s19 + $0x48] sm:$0xf]  ;;  %v441_v8 = vld [vmem:[%s426_s19 + $0x40] sm:$0xf]  ;;  %v440_v9 = vld [vmem:[%s426_s19 + $0x38] sm:$0xff]  ;;  %s1965_s17 = sshll.u32 %s419_s16, 3 }
  0x19   : > { %v537_v10 = vand.u32 4294901760, %v2234_v6  ;;  %v458_v11 = vsel %vm2936_vm1, %v442_v7, 0  ;;  %v455_v12 = vsel %vm2936_vm1, %v441_v8, 0  ;;  %v2242_v13 = vand.u32 4294901760, %v440_v9  ;;  %v439_v14 = vld [vmem:[%s426_s19 + $0x30] sm:$0xff]  ;;  %v438_v15 = vld [vmem:[%s426_s19 + $0x28] sm:$0xff] }
  0x1a   : > { %v437_v16 = vld [vmem:[%s426_s19 + $0x20] sm:$0xff]  ;;  %v2244_v17 = vand.u32 4294901760, %v458_v11  ;;  %v2246_v18 = vand.u32 4294901760, %v455_v12  ;;  %v2248_v19 = vand.u32 4294901760, %v439_v14  ;;  %v2250_v20 = vand.u32 4294901760, %v438_v15  ;;  %v436_v21 = vld [vmem:[%s426_s19 + $0x18] sm:$0xff] }
  0x1b   : > { %v435_v22 = vld [vmem:[%s426_s19 + $0x10] sm:$0xff]  ;;  %v2252_v23 = vand.u32 4294901760, %v437_v16  ;;  %v2254_v24 = vand.u32 4294901760, %v436_v21  ;;  %v434_v26 = vld [vmem:[%s426_s19 + $0x8] sm:$0xff]  ;;  %v433_v27 = vld [vmem:[%s426_s19] sm:$0xff]  ;;  %v2259_v28 = vsub.f32 %v440_v9, %v2242_v13  ;;  %v538_v32 = vsub.f32 %v2234_v6, %v537_v10  ;;  %s421_s18 = scalar_lea.vmem [#allocation2], %s1965_s17 }
  0x1c   : > { %v2256_v25 = vand.u32 4294901760, %v435_v22  ;;  %483 = vmatprep.subr.mxu0 %v2244_v17  ;;  %v2262_v29 = vand.u32 4294901760, %v434_v26  ;;  %v2265_v30 = vsub.f32 %v458_v11, %v2244_v17  ;;  %v2268_v31 = vsub.f32 %v455_v12, %v2246_v18  ;;  %s1890_s19 = sshll.u32 %s421_s18, 4  ;;  %s1891_s19 = int_to_ptr.vmem [resolvable:$true] %s1890_s19 }
  0x1d   : > { %485 = vmatpush1.msra.mxu0 %v2246_v18  ;;  %v2274_v33 = vand.u32 4294901760, %v433_v27  ;;  %v582_v34 = vand.u32 4294901760, %v2259_v28  ;;  %v2278_v35 = vsub.f32 %v439_v14, %v2248_v19  ;;  %v2281_v36 = vsub.f32 %v438_v15, %v2250_v20 }
  0x1e   : > { %487 = vmatprep.subr.mxu0 %v2242_v13  ;;  %v570_v37 = vand.u32 4294901760, %v2265_v30  ;;  %v576_v38 = vand.u32 4294901760, %v2268_v31  ;;  %v2287_v39 = vsub.f32 %v437_v16, %v2252_v23  ;;  %v2290_v40 = vsub.f32 %v436_v21, %v2254_v24 }
  0x1f   : > { %489 = vmatpush1.msra.mxu0 %v2248_v19  ;;  %v583_v41 = vsub.f32 %v2259_v28, %v582_v34  ;;  %v588_v42 = vand.u32 4294901760, %v2278_v35  ;;  %v594_v43 = vand.u32 4294901760, %v2281_v36  ;;  %v2299_v44 = vsub.f32 %v435_v22, %v2256_v25 }
  0x20   : > { %491 = vmatprep.subr.mxu0 %v2250_v20  ;;  %v571_v45 = vsub.f32 %v2265_v30, %v570_v37  ;;  %v577_v46 = vsub.f32 %v2268_v31, %v576_v38  ;;  %v600_v47 = vand.u32 4294901760, %v2287_v39  ;;  %v606_v48 = vand.u32 4294901760, %v2290_v40 }
  0x21   : > { %493 = vmatpush1.msra.mxu0 %v2252_v23  ;;  %v584_v49 = vand.u32 4294901760, %v583_v41  ;;  %v589_v50 = vsub.f32 %v2278_v35, %v588_v42  ;;  %v595_v51 = vsub.f32 %v2281_v36, %v594_v43  ;;  %v612_v52 = vand.u32 4294901760, %v2299_v44 }
  0x22   : > { %495 = vmatprep.subr.mxu0 %v2254_v24  ;;  %v572_v53 = vand.u32 4294901760, %v571_v45  ;;  %v578_v54 = vand.u32 4294901760, %v577_v46  ;;  %v601_v55 = vsub.f32 %v2287_v39, %v600_v47  ;;  %v607_v56 = vsub.f32 %v2290_v40, %v606_v48 }
  0x23   : > { %497 = vmatpush1.msra.mxu0 %v2256_v25  ;;  %v539_v57 = vand.u32 4294901760, %v538_v32  ;;  %v590_v58 = vand.u32 4294901760, %v589_v50  ;;  %v613_v59 = vsub.f32 %v2299_v44, %v612_v52  ;;  %v617_v60 = vsub.f32 %v434_v26, %v2262_v29 }
  0x24   : > { %499 = vmatprep.subr.mxu0 %v2262_v29  ;;  %573 = vmatprep.subr.mxu1 %v572_v53  ;;  %v596_v61 = vand.u32 4294901760, %v595_v51  ;;  %v623_v62 = vsub.f32 %v433_v27, %v2274_v33  ;;  %v602_v63 = vand.u32 4294901760, %v601_v55  ;;  %v608_v2 = vand.u32 4294901760, %v607_v56 }
  0x25   : > { %501 = vmatpush1.msra.mxu0 %v2274_v33  ;;  %579 = vmatpush1.msra.mxu1 %v578_v54  ;;  %v618_v0 = vand.u32 4294901760, %v617_v60  ;;  %v614_v7 = vand.u32 4294901760, %v613_v59 }
  0x26   : > { %585 = vmatprep.subr.mxu1 %v584_v49  ;;  %692 = vmatprep.subr.mxu0 %v2265_v30  ;;  %v624_v3 = vand.u32 4294901760, %v623_v62 }
  0x27   : > { %540 = vmatmul.mubr.f32.vlgmr.msra.gmra.mxu0 %v539_v57  ;;  %591 = vmatpush1.msra.mxu1 %v590_v58  ;;  %v619_v8 = vsub.f32 %v617_v60, %v618_v0 }
  0x28   : > { %695 = vmatpush1.msra.mxu0 %v2268_v31  ;;  %597 = vmatprep.subr.mxu1 %v596_v61  ;;  %v625_v9 = vsub.f32 %v623_v62, %v624_v3 }
  0x29   : > { %698 = vmatprep.subr.mxu0 %v2259_v28  ;;  %603 = vmatpush1.msra.mxu1 %v602_v63  ;;  %v620_v11 = vand.u32 4294901760, %v619_v8 }
  0x2a   : > { %701 = vmatpush1.msra.mxu0 %v2278_v35  ;;  %609 = vmatprep.subr.mxu1 %v608_v2  ;;  %v626_v12 = vand.u32 4294901760, %v625_v9 }
  0x2b   : > { %704 = vmatprep.subr.mxu0 %v2281_v36  ;;  %615 = vmatpush1.msra.mxu1 %v614_v7 }
  0x2c   : > { %707 = vmatpush1.msra.mxu0 %v2287_v39  ;;  %621 = vmatprep.subr.mxu1 %v620_v11 }
  0x2d   : > { %710 = vmatprep.subr.mxu0 %v2290_v40  ;;  %627 = vmatpush1.msra.mxu1 %v626_v12  ;;  %v2418_v40 = vld [vmem:[%s2926_s3] sm:$0x3] }
  0x2e   : > { %713 = vmatpush1.msra.mxu0 %v2299_v44  ;;  %662 = vmatmul.mubr.f32.vlgmr.msra.gmra.mxu1 %v2228_v4  ;;  %v2421_v41 = vadd.s32 1, %v2418_v40  ;;  %vm1071_vm6 = vcmp.ge.s32.totalorder %v2418_v40, 0  ;;  %v1037_v44 = vlaneseq  ;;  %v2434_v45 = vadd.s32 4294967295, %v2418_v40 }
  0x2f   : > { %716 = vmatprep.subr.mxu0 %v617_v60  ;;  %784 = vmatprep.subr.mxu1 %v2244_v17  ;;  %vm1073_vm10 = vcmp.lt.s32.totalorder %v2418_v40, 16 }
  0x30   : > { %719 = vmatpush1.msra.mxu0 %v623_v62  ;;  %752 = vmatprep.mubr.f32.mxu0 %v2091_v1  ;;  %vm1096_vm8 = vcmp.ge.s32.totalorder %v2421_v41, 0  ;;  %vm2937_vm12 = vcmp.lt.s32.totalorder %v2421_v41, 16  ;;  %v1053_v46 = vshrl.u32 %v1037_v44, 7  ;;  %v2483_v56 = vand.u32 127, %v1037_v44 }
  0x31   : > { %786 = vmatpush1.msra.mxu1 %v2246_v18  ;;  %755 = vmatmul.mubr.f32.vlgmr.msra.gmra.mxu0 %v2234_v6 }
  0x32   : > { %788 = vmatprep.subr.mxu1 %v2242_v13  ;;  %870 = vmatprep.subr.mxu0 %v570_v37  ;;  %v1278_v37 = vld [vmem:[%s2930_s7] sm:$0xf]  ;;  %v2465_v49 = vsub.s32 0, %v1053_v46  ;;  %v2467_v50 = vsub.s32 1, %v1053_v46 }
  0x33   : > { %790 = vmatpush1.msra.mxu1 %v2248_v19  ;;  %874 = vmatpush1.msra.mxu0 %v576_v38  ;;  %v1031_v38 = vld [vmem:[%s2925_s2] sm:$0x3] }
  0x34   : > { %792 = vmatprep.subr.mxu1 %v2250_v20  ;;  %878 = vmatprep.subr.mxu0 %v582_v34  ;;  %v1182_v39 = vadd.s32 1, %v1031_v38  ;;  %vm1120_vm2 = vcmp.ge.s32.totalorder %v1031_v38, 0  ;;  %vm1121_vm3 = vcmp.lt.s32.totalorder %v1031_v38, 16 }
  0x35   : > { %794 = vmatpush1.msra.mxu1 %v2252_v23  ;;  %882 = vmatpush1.msra.mxu0 %v588_v42  ;;  %vm2424_vm7 = vmand %vm1120_vm2, %vm1121_vm3  ;;  %vm1047_vm2 = vcmp.ge.s32.totalorder %v2434_v45, 0 }
  0x36   : > { %796 = vmatprep.subr.mxu1 %v2254_v24  ;;  %886 = vmatprep.subr.mxu0 %v594_v43  ;;  %vm1183_vm4 = vcmp.ge.s32.totalorder %v1182_v39, 0  ;;  %vm1184_vm5 = vcmp.lt.s32.totalorder %v1182_v39, 16  ;;  %vm1138_vm11 = vmand %vm2424_vm7, %vm1071_vm6 }
  0x37   : > { %798 = vmatpush1.msra.mxu1 %v2256_v25  ;;  %890 = vmatpush1.msra.mxu0 %v600_v47  ;;  %vm2429_vm9 = vmand %vm1183_vm4, %vm1184_vm5  ;;  %v1042_v47 = vadd.s32 4294967295, %v1031_v38  ;;  %vm1049_vm5 = vcmp.lt.s32.totalorder %v2434_v45, 16 }
  0x38   : > { %800 = vmatprep.subr.mxu1 %v2262_v29  ;;  %894 = vmatprep.subr.mxu0 %v606_v48  ;;  %vm1230_vm13 = vmand %vm2429_vm9, %vm1096_vm8  ;;  %v1277_v48 = vld [vmem:[%s2929_s6] sm:$0xf] }
  0x39   : > { %802 = vmatpush1.msra.mxu1 %v2274_v33  ;;  %835 = vmatprep.mubr.f32.mxu1 %v2091_v1  ;;  %vm1160_vm14 = vmand %vm2424_vm7, %vm1096_vm8  ;;  %v1285_v55 = vsel %vm449_vm0, %v1277_v48, 0 }
  0x3a   : > { %898 = vmatpush1.msra.mxu0 %v612_v52  ;;  %839 = vmatmul.mubr.f32.vlgmr.msra.gmra.mxu1 %v537_v10  ;;  %vm1139_vm15 = vmand %vm1138_vm11, %vm1073_vm10  ;;  %v2506_v7 = vand.u32 4294901760, %v1285_v55 }
  0x3b   : > { %902 = vmatprep.subr.mxu0 %v618_v0  ;;  %970 = vmatprep.subr.mxu1 %v2244_v17  ;;  %vm1231_vm3 = vmand %vm1230_vm13, %vm2937_vm12  ;;  %v1140_v52 = vsel %vm1139_vm15, 1, %v2092_v5  ;;  %vm1227_vm15 = vcmp.lt.s32.totalorder %v2483_v56, 111 }
  0x3c   : > { %906 = vmatpush1.msra.mxu0 %v624_v3  ;;  %939 = vmatprep.mubr.f32.mxu0 %v2091_v1  ;;  %vm1161_vm4 = vmand %vm1160_vm14, %vm2937_vm12  ;;  %v1232_v51 = vsel %vm1231_vm3, 1, %v2092_v5  ;;  %vm1043_vm14 = vcmp.ge.s32.totalorder %v1042_v47, 0  ;;  %vm1044_vm12 = vcmp.lt.s32.totalorder %v1042_v47, 16  ;;  %v1144_v59 = vrot.slane %v1140_v52, %v2465_v49 }
  0x3d   : > { %972 = vmatpush1.msra.mxu1 %v2246_v18  ;;  %941 = vmatmul.mubr.f32.vlgmr.msra.gmra.mxu0 %v2228_v4  ;;  %vm1186_vm1 = vmand %vm2429_vm9, %vm1047_vm2  ;;  %v1162_v53 = vsel %vm1161_vm4, 1, %v2092_v5  ;;  %v1236_v57 = vrot.slane %v1232_v51, %v2465_v49  ;;  %v1240_v58 = vrot.slane %v1232_v51, %v2467_v50  ;;  %v1148_v60 = vrot.slane %v1140_v52, %v2467_v50 }
  0x3e   : > { %974 = vmatprep.subr.mxu1 %v2242_v13  ;;  %1021 = vmatprep.mubr.f32.mxu1 %v2091_v1  ;;  %vm1123_vm11 = vmand %vm2424_vm7, %vm1047_vm2  ;;  %v1166_v63 = vrot.slane %v1162_v53, %v2465_v49  ;;  %v1170_v0 = vrot.slane %v1162_v53, %v2467_v50  ;;  %vm2524_vm4 = vcmp.eq.s32.totalorder %v1144_v59, 1 }
  0x3f   : > { %976 = vmatpush1.msra.mxu1 %v2248_v19  ;;  %1367 = vmatprep.mubr.f32.mxu0 %v2091_v1  ;;  %vm2478_vm13 = vmand %vm1186_vm1, %vm1049_vm5  ;;  %vm2520_vm3 = vcmp.eq.s32.totalorder %v1240_v58, 1 }
  0x40   : > { %978 = vmatprep.subr.mxu1 %v2250_v20  ;;  %vm1124_vm7 = vmand %vm1123_vm11, %vm1049_vm5  ;;  %v1188_v3 = vsel %vm2478_vm13, 1, %v2092_v5  ;;  %vm2528_vm11 = vcmp.eq.s32.totalorder %v1148_v60, 1 }
  0x41   : > { %980 = vmatpush1.msra.mxu1 %v2252_v23  ;;  %vm1208_vm1 = vmand %vm2429_vm9, %vm1071_vm6  ;;  %v1125_v8 = vsel %vm1124_vm7, 1, %v2092_v5  ;;  %vm2541_vm7 = vcmp.eq.s32.totalorder %v1166_v63, 1 }
  0x42   : > { %982 = vmatprep.subr.mxu1 %v2254_v24  ;;  %vm2499_vm0 = vmand %vm1043_vm14, %vm1044_vm12  ;;  %vm2516_vm12 = vcmp.eq.s32.totalorder %v1236_v57, 1 }
  0x43   : > { %984 = vmatpush1.msra.mxu1 %v2256_v25  ;;  %vm2512_vm9 = vmand %vm1208_vm1, %vm1073_vm10  ;;  %vm2545_vm1 = vcmp.eq.s32.totalorder %v1170_v0, 1 }
  0x44   : > { %986 = vmatprep.subr.mxu1 %v2262_v29  ;;  %vm2536_vm13 = vmand %vm2499_vm0, %vm1071_vm6 }
  0x45   : > { %988 = vmatpush1.msra.mxu1 %v2274_v33  ;;  %vm1097_vm6 = vmand %vm2499_vm0, %vm1096_vm8 }
  0x46   : > { %1023 = vmatmul.mubr.f32.vlgmr.msra.gmra.mxu1 %v2228_v4  ;;  %vm2564_vm14 = vmand %vm2499_vm0, %vm1047_vm2  ;;  %vm2968_vm2 = vcmask 1043456  }
  0x47   : > { %1493 = vmatprep.mubr.f32.mxu1 %v2091_v1  ;;  %vm2580_vm8 = vmand %vm2536_vm13, %vm1073_vm10  ;;  %vm1179_vm10 = vcmp.lt.s32.totalorder %v2483_v56, 113 }
  0x48   : > { %vm2969_vm0 = vmmov %vm2968_vm2  ;;  %v1075_v44 = vsel %vm2580_vm8, 1, %v2092_v5 }
  0x91   : > { %v447_v10 = vpop.permute.xlu0 %446 }
  0xe7   : > { %v541_v6 = vpop.f32.mrf.mxu0 }
  0xe8   : > { %v542_v15 = vadd.f32 %v541_v6, %v447_v10 }
  0xe9   : > { %v543_v13 = vpop.f32.mrf.mxu0 }
  0xea   : > { %v544_v16 = vadd.f32 %v543_v13, %v447_v10 }
  0xee   : > { %v663_v14 = vpop.f32.mrf.mxu1 }
  0xef   : > { %v664_v19 = vadd.f32 %v663_v14, %v542_v15 }
  0xf0   : > { %v665_v17 = vpop.f32.mrf.mxu1 }
  0xf1   : > { %v756_v18 = vpop.f32.mrf.mxu0  ;;  %v666_v21 = vadd.f32 %v665_v17, %v544_v16 }
  0xf2   : > { %v757_v23 = vadd.f32 %v756_v18, %v664_v19  ;;  %v1192_v18 = vrot.slane %v1188_v3, %v2465_v49 }
  0xf3   : > { %v758_v22 = vpop.f32.mrf.mxu0 }
  0xf4   : > { %v759_v26 = vadd.f32 %v758_v22, %v666_v21  ;;  %v1129_v21 = vrot.slane %v1125_v8, %v2465_v49  ;;  %v1133_v22 = vrot.slane %v1125_v8, %v2467_v50 }
  0xfa   : > { %v840_v20 = vpop.f32.mrf.mxu1 }
  0xfb   : > { %v841_v27 = vadd.f32 %v840_v20, %v757_v23 }
  0xfc   : > { %v842_v24 = vpop.f32.mrf.mxu1 }
  0xfd   : > { %v942_v25 = vpop.f32.mrf.mxu0  ;;  %v843_v4 = vadd.f32 %v842_v24, %v759_v26  ;;  %v1196_v26 = vrot.slane %v1188_v3, %v2467_v50  ;;  %v1079_v3 = vrot.slane %v1075_v44, %v2465_v49 }
  0xfe   : > { %v943_v29 = vadd.f32 %v942_v25, %v841_v27  ;;  %v1210_v27 = vsel %vm2512_vm9, 1, %v2092_v5  ;;  %vm1117_vm9 = vcmp.lt.s32.totalorder %v2483_v56, 1 }
  0xff   : > { %v944_v28 = vpop.f32.mrf.mxu0  ;;  %v1214_v43 = vrot.slane %v1210_v27, %v2465_v49  ;;  %vm2648_vm8 = vcmp.eq.s32.totalorder %v1196_v26, 1  ;;  %v1218_v53 = vrot.slane %v1210_v27, %v2467_v50 }
 0x100   : > { %v945_v31 = vadd.f32 %v944_v28, %v843_v4 }
 0x106   : > { %v1024_v30 = vpop.f32.mrf.mxu1 }
 0x107   : > { %v1025_v32 = vadd.f32 %v1024_v30, %v943_v29 }
 0x108   : > { %v1026_v33 = vpop.f32.mrf.mxu1 }
 0x109   : > { %v2389_v34 = vmax.f32 %v1025_v32, 0.0  ;;  %v1027_v35 = vadd.f32 %v1026_v33, %v945_v31  ;;  %v2596_v32 = vsub.f32 %v1285_v55, %v2506_v7 }
 0x10b   : > { %1223 = vrot.lane.b32.xlu1 %v2389_v34, %s2093_s20  ;;  %1201 = vrot.lane.b32.xlu0 %v2389_v34, %s2094_s10  ;;  %v2393_v36 = vmax.f32 %v1027_v35, 0.0  ;;  %v1151_v30 = vsel %vm2524_vm4, %v2389_v34, 0.0  ;;  %vm2975_vm4 = vcmp.lt.s32.totalorder %v2483_v56, 127  ;;  %v1370_v57 = vand.u32 4294901760, %v2596_v32 }
 0x10c   : > { %vm2976_vm13 = vmmov %vm2975_vm4 }
 0x10d   : > { %v1152_v38 = vsel %vm2528_vm11, %v2393_v36, 0.0  ;;  %vm2619_vm11 = vcmp.eq.s32.totalorder %v1129_v21, 1 }
 0x10f   : > { %1153 = vrot.lane.b32.xlu1 %v2389_v34, %s2095_s24  ;;  %1225 = vrot.lane.b32.xlu0 %v2393_v36, %s2093_s20 }
 0x113   : > { %1175 = vrot.lane.b32.xlu1 %v2389_v34, %s2096_s25  ;;  %1155 = vrot.lane.b32.xlu0 %v2393_v36, %s2095_s24 }
 0x117   : > { %1113 = vrot.lane.b32.xlu1 %v2389_v34, %s2097_s29  ;;  %1177 = vrot.lane.b32.xlu0 %v2393_v36, %s2096_s25  ;;  %s1876_s25 = scalar_lea.sflag [#allocation3], %s419_s16 }
 0x11b   : > { %1064 = vrot.lane.b32.xlu1 %v2389_v34, %s2098_s30  ;;  %1115 = vrot.lane.b32.xlu0 %v2393_v36, %s2097_s29  ;;  %s1974_s29 = sshll.u32 %s2226_s15, 3  ;;  %s1975_s15 = sshll.u32 %s2188_s9, 7 }
 0x11c   : > { %s1888_s24 = scalar_lea.hbm %s2935_s12, %s1975_s15 }
 0x11f   : > { %1203 = vrot.lane.b32.xlu1 %v2393_v36, %s2094_s10  ;;  %1066 = vrot.lane.b32.xlu0 %v2393_v36, %s2098_s30  ;;  %s2101_s30 = smov [#allocation2]  }
 0x123   : > { %1088 = vrot.lane.b32.xlu1 %v2389_v34, %s2099_s13  ;;  %1090 = vrot.lane.b32.xlu0 %v2393_v36, %s2099_s13  ;;  %s2033_s13 = sshll.u32 %s2101_s30, 4  ;;  %s2034_s13 = int_to_ptr.vmem [resolvable:$false] %s2033_s13 }
 0x124   : > { %s2035_s9 = scalar_lea.vmem %s2034_s13, 256  ;;  %p2036_p0 = scmp.lt.s32.totalorder %s1891_s19, %s2034_s13 }
 0x127   : > { %1033 = vrot.lane.b32.xlu1 %v2389_v34, %s2100_s14  ;;  %1035 = vrot.lane.b32.xlu0 %v2393_v36, %s2100_s14  ;;  %s431_s14 = scalar_lea.vmem %s2924_s1, %s1974_s29  ;;  %s2029_s29 = scalar_lea.vmem %s1891_s19, 128 }
 0x128   : > { %p2030_p11 = scmp.ne.s32.totalorder %s1891_s19, %s2029_s29  ;;  %p2037_p1 = scmp.lt.s32.totalorder %s2035_s9, %s2029_s29 }
 0x12a   : > { %p2031_p12 = pnand %p2030_p11, %p2205_p5  ;;  %p2038_p2 = por %p2037_p1, %p2036_p0 }
 0x12b   : > { %1281 = vperm.xlu1 %2027, %v1278_v37  }
 0x12c   : > { %p2032_p13 = pneg %p2031_p12 }
 0x12e   : > { %p2039_p3 = pnand %p2038_p2, %p2032_p13 }
 0x17d   : > { %v1224_v61 = vpop.permute.xlu1 %1223  ;;  %v2495_v62 = vpop.permute.xlu0 %1201 }
 0x181   : > { %v1154_v14 = vpop.permute.xlu1 %1153  ;;  %v1226_v15 = vpop.permute.xlu0 %1225 }
 0x182   : > { %v1228_v19 = vsel %vm1227_vm15, %v1224_v61, %v1226_v15  ;;  %v1229_v20 = vsel %vm1227_vm15, %v1226_v15, %v1224_v61  ;;  %vm2970_vm15 = vcmp.lt.s32.totalorder %v2421_v41, 16 }
 0x183   : > { %v1243_v24 = vsel %vm2516_vm12, %v1228_v19, 0.0  ;;  %v1244_v25 = vsel %vm2520_vm3, %v1229_v20, 0.0  ;;  %vm2591_vm12 = vmand %vm1097_vm6, %vm2970_vm15  ;;  %vm2623_vm6 = vcmp.eq.s32.totalorder %v1133_v22, 1 }
 0x184   : > { %v1288_v28 = vsel %vm2968_vm2, %v1243_v24, 0  ;;  %v1291_v29 = vsel %vm2969_vm0, %v1244_v25, 0  ;;  %vm2611_vm3 = vmand %vm2564_vm14, %vm1049_vm5  ;;  %vm1205_vm5 = vcmp.lt.s32.totalorder %v2483_v56, 112  ;;  %vm2644_vm14 = vcmp.eq.s32.totalorder %v1192_v18, 1 }
 0x185   : > { %v2598_v33 = vand.u32 4294901760, %v1291_v29  ;;  %v2600_v35 = vand.u32 4294901760, %v1288_v28  ;;  %v1176_v37 = vpop.permute.xlu1 %1175  ;;  %v1156_v39 = vpop.permute.xlu0 %1155  ;;  %v1100_v54 = vsel %vm2591_vm12, 1, %v2092_v5  ;;  %v1051_v55 = vsel %vm2611_vm3, 1, %v2092_v5  ;;  %vm2989_vm15 = vmmov %vm2969_vm0 }
 0x186   : > { %v1158_v40 = vsel %vm2975_vm4, %v1154_v14, %v1156_v39  ;;  %v1159_v41 = vsel %vm2976_vm13, %v1156_v39, %v1154_v14  ;;  %v1083_v5 = vrot.slane %v1075_v44, %v2467_v50  ;;  %v1104_v11 = vrot.slane %v1100_v54, %v2465_v49 }
 0x187   : > { %v2632_v45 = vsub.f32 %v1291_v29, %v2598_v33  ;;  %v2635_v46 = vsub.f32 %v1288_v28, %v2600_v35  ;;  %v1173_v47 = vsel %vm2541_vm7, %v1158_v40, 0.0  ;;  %v1174_v48 = vsel %vm2545_vm1, %v1159_v41, 0.0  ;;  %1316 = vmatprep.subr.mxu0 %v2598_v33 }
 0x188   : > { %1318 = vmatpush1.msra.mxu0 %v2600_v35  ;;  %v1259_v59 = vrot.slane %v1173_v47, 4  ;;  %v1260_v60 = vrot.slane %v1174_v48, 4  ;;  %vm2662_vm7 = vcmp.eq.s32.totalorder %v1214_v43, 1  ;;  %vm1068_vm1 = vcmp.lt.s32.totalorder %v2483_v56, 16 }
 0x189   : > { %v1409_v58 = vand.u32 4294901760, %v2635_v46  ;;  %v1114_v61 = vpop.permute.xlu1 %1113  ;;  %v1178_v63 = vpop.permute.xlu0 %1177  ;;  %v1403_v0 = vand.u32 4294901760, %v2632_v45  ;;  %v1108_v12 = vrot.slane %v1100_v54, %v2467_v50  ;;  %vm2677_vm2 = vcmp.eq.s32.totalorder %v1218_v53, 1 }
 0x18a   : > { %v1055_v10 = vrot.slane %v1051_v55, %v2465_v49  ;;  %v1059_v13 = vrot.slane %v1051_v55, %v2467_v50  ;;  %v2686_v14 = vsub.f32 %v2596_v32, %v1370_v57  ;;  %v1273_v15 = vsel %vm2969_vm0, %v1151_v30, %v1259_v59 }
 0x18b   : > { %v1404_v8 = vsub.f32 %v2632_v45, %v1403_v0  ;;  %v1410_v9 = vsub.f32 %v2635_v46, %v1409_v58  ;;  %v1274_v16 = vsel %vm2989_vm15, %v1152_v38, %v1260_v60  ;;  %vm2694_vm12 = vcmp.eq.s32.totalorder %v1079_v3, 1 }
 0x18c   : > { %vm2698_vm3 = vcmp.eq.s32.totalorder %v1083_v5, 1  ;;  %vm1092_vm4 = vcmp.lt.s32.totalorder %v2483_v56, 15  ;;  %vm2703_vm13 = vcmp.eq.s32.totalorder %v1104_v11, 1  ;;  %vm2707_vm0 = vcmp.eq.s32.totalorder %v1108_v12, 1 }
 0x18d   : > { %v1065_v17 = vpop.permute.xlu1 %1064  ;;  %v1116_v18 = vpop.permute.xlu0 %1115  ;;  %v1405_v19 = vand.u32 4294901760, %v1404_v8  ;;  %v1411_v20 = vand.u32 4294901760, %v1410_v9  ;;  %v1180_v25 = vsel %vm1179_vm10, %v1176_v37, %v1178_v63  ;;  %v1181_v26 = vsel %vm1179_vm10, %v1178_v63, %v1176_v37 }
 0x18e   : > { %v1118_v21 = vsel %vm1117_vm9, %v1114_v61, %v1116_v18  ;;  %v1119_v49 = vsel %vm1117_vm9, %v1116_v18, %v1114_v61  ;;  %vm2716_vm15 = vcmp.eq.s32.totalorder %v1055_v10, 1  ;;  %v2720_v4 = vand.u32 4294901760, %v1274_v16 }
 0x18f   : > { %1406 = vmatprep.subr.mxu1 %v1405_v19  ;;  %v2722_v28 = vand.u32 4294901760, %v1273_v15  ;;  %v1136_v29 = vsel %vm2619_vm11, %v1119_v49, 0.0  ;;  %v1137_v30 = vsel %vm2623_vm6, %v1118_v21, 0.0  ;;  %vm2728_vm9 = vcmp.eq.s32.totalorder %v1059_v13, 1 }
 0x190   : > { %1412 = vmatpush1.msra.mxu1 %v1411_v20  ;;  %v1372_v37 = vand.u32 4294901760, %v2686_v14  ;;  %v1199_v42 = vsel %vm2644_vm14, %v1180_v25, 0.0  ;;  %v1200_v43 = vsel %vm2648_vm8, %v1181_v26, 0.0  ;;  %v2752_v53 = vsub.f32 %v1274_v16, %v2720_v4 }
 0x191   : > { %v1204_v31 = vpop.permute.xlu1 %1203  ;;  %v1067_v38 = vpop.permute.xlu0 %1066  ;;  %v2755_v54 = vsub.f32 %v1273_v15, %v2722_v28  ;;  %v1253_v55 = vrot.slane %v1136_v29, 4  ;;  %v1254_v51 = vrot.slane %v1137_v30, 4  ;;  %vm3002_vm10 = vcmask 1043456  }
 0x192   : > { %v1206_v34 = vsel %vm1205_vm5, %v2495_v62, %v1204_v31  ;;  %v1207_v40 = vsel %vm1205_vm5, %v1204_v31, %v2495_v62  ;;  %v1069_v41 = vsel %vm1068_vm1, %v1065_v17, %v1067_v38  ;;  %v1070_v36 = vsel %vm1068_vm1, %v1067_v38, %v1065_v17  ;;  %vm3003_vm11 = vmmov %vm3002_vm10 }
 0x193   : > { %v1221_v44 = vsel %vm2662_vm7, %v1206_v34, 0.0  ;;  %v1222_v47 = vsel %vm2677_vm2, %v1207_v40, 0.0  ;;  %v1086_v52 = vsel %vm2694_vm12, %v1070_v36, 0.0  ;;  %v1087_v59 = vsel %vm2698_vm3, %v1069_v41, 0.0  ;;  %vm3004_vm6 = vmmov %vm3002_vm10 }
 0x194   : > { %v1265_v48 = vrot.slane %v1221_v44, 4  ;;  %v1266_v62 = vrot.slane %v1222_v47, 4  ;;  %vm3005_vm5 = vmmov %vm3004_vm6  ;;  %v1427_v13 = vand.u32 4294901760, %v2752_v53  ;;  %v1433_v15 = vand.u32 4294901760, %v2755_v54 }
 0x195   : > { %v1089_v60 = vpop.permute.xlu1 %1088  ;;  %v1091_v61 = vpop.permute.xlu0 %1090  ;;  %v1247_v49 = vrot.slane %v1086_v52, 4  ;;  %v1248_v50 = vrot.slane %v1087_v59, 4  ;;  %vm3006_vm14 = vcmp.lt.s32.totalorder %v2483_v56, 17  ;;  %vm3008_vm7 = vmmov %vm3005_vm5 }
 0x196   : > { %v1275_v63 = vsel %vm3002_vm10, %v1199_v42, %v1265_v48  ;;  %v1276_v2 = vsel %vm3003_vm11, %v1200_v43, %v1266_v62  ;;  %v1093_v3 = vsel %vm1092_vm4, %v1089_v60, %v1091_v61  ;;  %v1094_v5 = vsel %vm1092_vm4, %v1091_v61, %v1089_v60  ;;  %vm3007_vm8 = vmmov %vm3006_vm14 }
 0x197   : > { %v1111_v8 = vsel %vm2703_vm13, %v1094_v5, 0.0  ;;  %v1112_v9 = vsel %vm2707_vm0, %v1093_v3, 0.0  ;;  %v2771_v11 = vand.u32 4294901760, %v1276_v2  ;;  %v2773_v12 = vand.u32 4294901760, %v1275_v63  ;;  %vm3009_vm1 = vmmov %vm3005_vm5 }
 0x198   : > { %v1271_v6 = vsel %vm3004_vm6, %v1111_v8, %v1253_v55  ;;  %v1272_v10 = vsel %vm3005_vm5, %v1112_v9, %v1254_v51  ;;  %v1428_v42 = vsub.f32 %v2752_v53, %v1427_v13  ;;  %v1434_v47 = vsub.f32 %v2755_v54, %v1433_v15 }
 0x199   : > { %v2779_v16 = vand.u32 4294901760, %v1272_v10  ;;  %v2781_v17 = vand.u32 4294901760, %v1271_v6  ;;  %v1034_v18 = vpop.permute.xlu1 %1033  ;;  %1320 = vmatprep.subr.mxu0 %v2771_v11  ;;  %v1036_v19 = vpop.permute.xlu0 %1035  ;;  %v2785_v20 = vsub.f32 %v1276_v2, %v2771_v11  ;;  %v2788_v21 = vsub.f32 %v1275_v63, %v2773_v12 }
 0x19a   : > { %v1040_v22 = vsel %vm3006_vm14, %v1034_v18, %v1036_v19  ;;  %v1041_v23 = vsel %vm3007_vm8, %v1036_v19, %v1034_v18  ;;  %1322 = vmatpush1.msra.mxu0 %v2773_v12  ;;  %v1429_v60 = vand.u32 4294901760, %v1428_v42  ;;  %v1435_v61 = vand.u32 4294901760, %v1434_v47 }
 0x19b   : > { %v2796_v24 = vsub.f32 %v1272_v10, %v2779_v16  ;;  %v2799_v25 = vsub.f32 %v1271_v6, %v2781_v17  ;;  %v1062_v26 = vsel %vm2716_vm15, %v1041_v23, 0.0  ;;  %v1063_v29 = vsel %vm2728_vm9, %v1040_v22, 0.0  ;;  %1324 = vmatprep.subr.mxu0 %v2720_v4  ;;  %v1862_v10 = vld [vmem:[%s431_s14] sm:$0xff] }
 0x19c   : > { %v1269_v30 = vsel %vm3008_vm7, %v1062_v26, %v1247_v49  ;;  %v1270_v56 = vsel %vm3009_vm1, %v1063_v29, %v1248_v50  ;;  %1326 = vmatpush1.msra.mxu0 %v2722_v28  ;;  %v1415_v31 = vand.u32 4294901760, %v2785_v20  ;;  %v1421_v38 = vand.u32 4294901760, %v2788_v21 }
 0x19d   : > { %v2811_v34 = vand.u32 4294901760, %v1270_v56  ;;  %v2813_v40 = vand.u32 4294901760, %v1269_v30  ;;  %1328 = vmatprep.subr.mxu0 %v2779_v16  ;;  %v1439_v27 = vand.u32 4294901760, %v2796_v24  ;;  %v1445_v39 = vand.u32 4294901760, %v2799_v25 }
 0x19e   : > { %1330 = vmatpush1.msra.mxu0 %v2781_v17  ;;  %v1416_v41 = vsub.f32 %v2785_v20, %v1415_v31  ;;  %v1422_v36 = vsub.f32 %v2788_v21, %v1421_v38  ;;  %v1864_v18 = vcombine.high %v1862_v10, %v1862_v10 }
 0x19f   : > { %v1450_v43 = vsub.f32 %v1270_v56, %v2811_v34  ;;  %v1456_v44 = vsub.f32 %v1269_v30, %v2813_v40  ;;  %1332 = vmatprep.subr.mxu0 %v2811_v34  ;;  %v1440_v55 = vsub.f32 %v2796_v24, %v1439_v27  ;;  %v1446_v51 = vsub.f32 %v2799_v25, %v1445_v39 }
 0x1a0   : > { %1334 = vmatpush1.msra.mxu0 %v2813_v40  ;;  %v1417_v48 = vand.u32 4294901760, %v1416_v41  ;;  %v1423_v62 = vand.u32 4294901760, %v1422_v36 }
 0x1a1   : > { %1525 = vmatprep.subr.mxu0 %v2632_v45  ;;  %1373 = vmatmul.mubr.f32.vlgmr.msra.gmra.mxu0 %v1372_v37  ;;  %v1451_v52 = vand.u32 4294901760, %v1450_v43  ;;  %v1457_v59 = vand.u32 4294901760, %v1456_v44  ;;  %v1441_v14 = vand.u32 4294901760, %v1440_v55  ;;  %v1447_v37 = vand.u32 4294901760, %v1446_v51 }
 0x1a2   : > { %1418 = vmatprep.subr.mxu1 %v1417_v48  ;;  %1528 = vmatpush1.msra.mxu0 %v2635_v46 }
 0x1a3   : > { %1424 = vmatpush1.msra.mxu1 %v1423_v62  ;;  %1531 = vmatprep.subr.mxu0 %v2785_v20  ;;  %v1452_v63 = vsub.f32 %v1450_v43, %v1451_v52  ;;  %v1458_v2 = vsub.f32 %v1456_v44, %v1457_v59 }
 0x1a4   : > { %1430 = vmatprep.subr.mxu1 %v1429_v60  ;;  %1534 = vmatpush1.msra.mxu0 %v2788_v21 }
 0x1a5   : > { %1436 = vmatpush1.msra.mxu1 %v1435_v61  ;;  %1537 = vmatprep.subr.mxu0 %v2752_v53  ;;  %v1453_v3 = vand.u32 4294901760, %v1452_v63  ;;  %v1459_v5 = vand.u32 4294901760, %v1458_v2 }
 0x1a6   : > { %1442 = vmatprep.subr.mxu1 %v1441_v14  ;;  %1540 = vmatpush1.msra.mxu0 %v2755_v54 }
 0x1a7   : > { %1448 = vmatpush1.msra.mxu1 %v1447_v37  ;;  %1543 = vmatprep.subr.mxu0 %v2796_v24 }
 0x1a8   : > { %1454 = vmatprep.subr.mxu1 %v1453_v3  ;;  %1546 = vmatpush1.msra.mxu0 %v2799_v25 }
 0x1a9   : > { %1460 = vmatpush1.msra.mxu1 %v1459_v5  ;;  %1549 = vmatprep.subr.mxu0 %v1450_v43 }
 0x1aa   : > { %1495 = vmatmul.mubr.f32.vlgmr.msra.gmra.mxu1 %v2506_v7  ;;  %1617 = vmatprep.subr.mxu1 %v2598_v33 }
 0x1ab   : > { %1552 = vmatpush1.msra.mxu0 %v1456_v44  ;;  %1585 = vmatprep.mubr.f32.mxu0 %v2091_v1 }
 0x1ac   : > { %1619 = vmatpush1.msra.mxu1 %v2600_v35  ;;  %1588 = vmatmul.mubr.f32.vlgmr.msra.gmra.mxu0 %v2596_v32 }
 0x1ad   : > { %1621 = vmatprep.subr.mxu1 %v2771_v11  ;;  %1703 = vmatprep.subr.mxu0 %v1403_v0 }
 0x1ae   : > { %1623 = vmatpush1.msra.mxu1 %v2773_v12  ;;  %1707 = vmatpush1.msra.mxu0 %v1409_v58 }
 0x1af   : > { %1625 = vmatprep.subr.mxu1 %v2720_v4  ;;  %1711 = vmatprep.subr.mxu0 %v1415_v31 }
 0x1b0   : > { %1627 = vmatpush1.msra.mxu1 %v2722_v28  ;;  %1715 = vmatpush1.msra.mxu0 %v1421_v38 }
 0x1b1   : > { %1629 = vmatprep.subr.mxu1 %v2779_v16  ;;  %1719 = vmatprep.subr.mxu0 %v1427_v13 }
 0x1b2   : > { %1631 = vmatpush1.msra.mxu1 %v2781_v17  ;;  %1723 = vmatpush1.msra.mxu0 %v1433_v15 }
 0x1b3   : > { %1633 = vmatprep.subr.mxu1 %v2811_v34  ;;  %1727 = vmatprep.subr.mxu0 %v1439_v27 }
 0x1b4   : > { %1635 = vmatpush1.msra.mxu1 %v2813_v40  ;;  %1668 = vmatprep.mubr.f32.mxu1 %v2091_v1 }
 0x1b5   : > { %1731 = vmatpush1.msra.mxu0 %v1445_v39  ;;  %1672 = vmatmul.mubr.f32.vlgmr.msra.gmra.mxu1 %v1370_v57 }
 0x1b6   : > { %1735 = vmatprep.subr.mxu0 %v1451_v52  ;;  %1803 = vmatprep.subr.mxu1 %v2598_v33  ;;  %v1282_v33 = vpop.permute.xlu1 %1281 }
 0x1b7   : > { %1739 = vmatpush1.msra.mxu0 %v1457_v59  ;;  %1772 = vmatprep.mubr.f32.mxu0 %v2091_v1 }
 0x1b8   : > { %1805 = vmatpush1.msra.mxu1 %v2600_v35  ;;  %1774 = vmatmul.mubr.f32.vlgmr.msra.gmra.mxu0 %v2506_v7 }
 0x1b9   : > { %1807 = vmatprep.subr.mxu1 %v2771_v11  ;;  %1854 = vmatprep.mubr.f32.mxu1 %v2091_v1 }
 0x1ba   : > { %1809 = vmatpush1.msra.mxu1 %v2773_v12 }
 0x1bb   : > { %1811 = vmatprep.subr.mxu1 %v2720_v4 }
 0x1bc   : > { %1813 = vmatpush1.msra.mxu1 %v2722_v28 }
 0x1bd   : > { %1815 = vmatprep.subr.mxu1 %v2779_v16 }
 0x1be   : > { %1817 = vmatpush1.msra.mxu1 %v2781_v17 }
 0x1bf   : > { %1819 = vmatprep.subr.mxu1 %v2811_v34 }
 0x1c0   : > { %1821 = vmatpush1.msra.mxu1 %v2813_v40 }
 0x1c1   : > { %1856 = vmatmul.mubr.f32.vlgmr.msra.gmra.mxu1 %v2506_v7 }
 0x261   : > { %v1374_v32 = vpop.f32.mrf.mxu0 }
 0x262   : > { %v1375_v45 = vadd.f32 %v1374_v32, %v1282_v33 }
 0x263   : > { %v1376_v1 = vpop.f32.mrf.mxu0 }
 0x264   : > { %v1377_v46 = vadd.f32 %v1376_v1, %v1282_v33 }
 0x26a   : > { %v1496_v35 = vpop.f32.mrf.mxu1 }
 0x26b   : > { %v1497_v0 = vadd.f32 %v1496_v35, %v1375_v45 }
 0x26c   : > { %v1498_v57 = vpop.f32.mrf.mxu1  ;;  %v1589_v58 = vpop.f32.mrf.mxu0 }
 0x26d   : > { %v1499_v28 = vadd.f32 %v1498_v57, %v1377_v46  ;;  %v1590_v54 = vadd.f32 %v1589_v58, %v1497_v0 }
 0x26e   : > { %v1591_v53 = vpop.f32.mrf.mxu0 }
 0x26f   : > { %v1592_v11 = vadd.f32 %v1591_v53, %v1499_v28 }
 0x275   : > { %v1673_v4 = vpop.f32.mrf.mxu1 }
 0x276   : > { %v1674_v12 = vadd.f32 %v1673_v4, %v1590_v54 }
 0x277   : > { %v1675_v8 = vpop.f32.mrf.mxu1 }
 0x278   : > { %v1775_v9 = vpop.f32.mrf.mxu0  ;;  %v1676_v7 = vadd.f32 %v1675_v8, %v1592_v11 }
 0x279   : > { %v1776_v13 = vadd.f32 %v1775_v9, %v1674_v12 }
 0x27a   : > { %v1777_v6 = vpop.f32.mrf.mxu0 }
 0x27b   : > { %v1778_v16 = vadd.f32 %v1777_v6, %v1676_v7 }
 0x281   : > { %v1857_v15 = vpop.f32.mrf.mxu1 }
 0x282   : > { %v1858_v17 = vadd.f32 %v1857_v15, %v1776_v13 }
 0x283   : > { %v1859_v19 = vpop.f32.mrf.mxu1 }
 0x284   : > { %v1866_v20 = vadd.f32 %v1862_v10, %v1858_v17  ;;  %v1860_v21 = vadd.f32 %v1859_v19, %v1778_v16 }
 0x286   : > { %v1867_v49 = vadd.f32 %v1864_v18, %v1860_v21  ;;  %v1868_v50 = vmax.f32 %v1866_v20, 0.0 }
 0x288   : > { %v1869_v22 = vmax.f32 %v1867_v49, 0.0 }
 0x28a   : > { %v1872_v23 = vcombine.low %v1868_v50, %v1869_v22 }
 0x28c   : > { %1874 = vst [vmem:[%s421_s18] sm:$0xff] %v1872_v23 }
 0x28d   : > { %2042 = shalt.err (!%p2039_p3)
}
 0x28e   : > { %s2043_s14 = scalar_lea.hbm %s1888_s24, 128  ;;  %s2047_s15 = scalar_lea.hbm %s2935_s12, 256 }
 0x28f   : > { %p2044_p4 = scmp.ne.s32.totalorder %s1888_s24, %s2043_s14  ;;  %p2048_p9 = scmp.lt.s32.totalorder %s1888_s24, %s2935_s12 }
 0x290   : > { %p2049_p10 = scmp.lt.s32.totalorder %s2047_s15, %s2043_s14 }
 0x291   : > { %p2045_p7 = pnand %p2044_p4, %p2205_p5 }
 0x292   : > { %p2050_p11 = por %p2049_p10, %p2048_p9 }
 0x293   : > { %p2046_p8 = pneg %p2045_p7 }
 0x295   : > { %p2051_p12 = pnand %p2050_p11, %p2046_p8 }
 0x297   : > { %2054 = shalt.err (!%p2051_p12)
}
 0x298   : > { %1977 = dma.vmem_to_hbm [thread:$0]  (%p2205_p5), %s1891_s19, 128, %s1888_s24, %s1876_s25  }
 0x299 PF: > { %p1983_p13 = scmp.ge.s32.totalorder %s2089_s8, 2  ;;  %s1902_s10 = sand.u32 1, %s2077_s21  }
 0x29a   : > { %s1903_s29 = scalar_lea.sflag [#allocation3], %s1902_s10 }
 0x29b   : > { %p1980_p0 = pnand %p1983_p13, %p2209_p6 }
 0x29d   : > { %p1981_p1 = pneg %p1980_p0 }
 0x29f   : > { %2072 = dma.done.wait (%p1981_p1), %s1903_s29, 128  }
 0x2a0   : > { %2074 = vsyncadd (%p1981_p1), %s1903_s29, 4294967168  ;;  %p22_p2 = scmp.ge.s32.totalorder %s2192_s11, 4   ;;  %s3010_s21 = smov %s2081_s22 }
 0x2a1   : > { %s3011_s22 = smov %s2085_s23  ;;  %s3012_s23 = smov %s2203_s26 }
 0x2a2   : > { %s3013_s8 = smov %s2192_s11  ;;  %24 = sbr.rel (!%p22_p2) target bundleno = 3 (0x3), region = 106 }
 0x2a7   :  { %1908 = vsyncpa [#allocation3], 1 }
 0x2a8   :  { %1910 = vsyncpa [#allocation3 + $0x1], 1 }

</bundles_post_ra>
